<compile_context>
chip_gen: v6e
topology: v6e:2x2x1
jax: 0.10.0
libtpu: 0.0.40
codegen_flags: <defaults>
</compile_context>

<pallas_src>
import functools
from typing import NamedTuple

import jax
import jax.numpy as jnp
from jax.experimental import pallas as pl
from jax.experimental.pallas import tpu as pltpu

_LANE = 128
_BLOCK_M_CANDIDATES = (512, 256, 128, 64, 32, 16, 8)
_BLOCK_P_CANDIDATES = (512, 256, 128)


def _round_up(v: int, m: int) -> int:
    return ((v + m - 1) // m) * m


def _cdiv(a: int, b: int) -> int:
    return -(-a // b)


def _pad2d(a, rows: int, cols: int):
    pr, pc = rows - a.shape[0], cols - a.shape[1]
    if pr or pc:
        a = jnp.pad(a, ((0, pr), (0, pc)))
    return a


def _sublane(dtype) -> int:
    # dtype-native sublane multiple: 8 (f32), 16 (bf16), 32 (int8/fp8).
    return max(8, 32 // jnp.dtype(dtype).itemsize)


def _vmem_budget_bytes() -> int:
    # ~87.5% of physical VMEM: headroom for compiler internal scratch,
    # semaphores and the X/out pipeline buffers.  Generation-aware
    # (128 MiB v5e/v6e, 64 MiB per-TC v7x); conservative fallback if the
    # query is unavailable.
    try:
        cap = int(pltpu.get_tpu_info().vmem_capacity_bytes)
    except Exception:
        cap = 64 * 1024 * 1024
    return (cap * 7) // 8


# --------------------------- kernels ---------------------------------------

def _mlp_kernel_resident(x_ref, w1_ref, b1_ref, w2_ref, b2_ref, o_ref):
    """Both weight matrices fully VMEM-resident; one batch tile per grid step."""
    h = jnp.dot(x_ref[...], w1_ref[...], preferred_element_type=jnp.float32)
    h = jnp.maximum(h + b1_ref[...].astype(jnp.float32), 0.0)
    # Feed h straight into the second matmul (no VMEM scratch round-trip).
    # Cast only matters for narrow compute dtypes (f32 path is exact).
    y = jnp.dot(h.astype(w2_ref.dtype), w2_ref[...],
                preferred_element_type=jnp.float32)
    o_ref[...] = (y + b2_ref[...].astype(jnp.float32)).astype(o_ref.dtype)


def _mlp_kernel_streamed(x_ref, w1_ref, b1_ref, w2_ref, b2_ref, o_ref, acc_ref):
    """Hidden dim P tiled as a trailing reduction axis; f32 accumulator."""
    k = pl.program_id(1)

    @pl.when(k == 0)
    def _():
        acc_ref[...] = jnp.zeros_like(acc_ref)

    h = jnp.dot(x_ref[...], w1_ref[...], preferred_element_type=jnp.float32)
    h = jnp.maximum(h + b1_ref[...].astype(jnp.float32), 0.0)
    acc_ref[...] += jnp.dot(h.astype(w2_ref.dtype), w2_ref[...],
                            preferred_element_type=jnp.float32)

    @pl.when(k == pl.num_programs(1) - 1)
    def _():
        o_ref[...] = (acc_ref[...]
                      + b2_ref[...].astype(jnp.float32)).astype(o_ref.dtype)


# --------------------------- parameter prep (once) --------------------------

class PaddedParams(NamedTuple):
    w1: jax.Array   # (n_p, P_p)
    b1: jax.Array   # (1, P_p)
    w2: jax.Array   # (P_p, C_p)
    b2: jax.Array   # (1, C_p)
    C: int          # logical output features


def prepare_params(w1, b1, w2, b2, *, compute_dtype=None) -> PaddedParams:
    """Pad (and optionally cast) the Linear parameters ONCE, outside the
    per-call path, so no per-call HBM->HBM weight copies are emitted.
    Shapes: w1 (n, P), b1 (P,), w2 (P, C), b2 (C,)."""
    if compute_dtype is not None:
        # Note: on v7x the MXU has no int8 path; use f32/bf16 (fp8 needs scaling).
        w1, b1, w2, b2 = (a.astype(compute_dtype) for a in (w1, b1, w2, b2))
    n, P = w1.shape
    C = w2.shape[1]
    n_p, P_p, C_p = (_round_up(d, _LANE) for d in (n, P, C))
    return PaddedParams(
        w1=_pad2d(w1, n_p, P_p),
        b1=_pad2d(b1.reshape(1, P), 1, P_p),
        w2=_pad2d(w2, P_p, C_p),
        b2=_pad2d(b2.reshape(1, C), 1, C_p),
        C=C,
    )


# --------------------------- forward ----------------------------------------

@functools.partial(
    jax.jit,
    static_argnames=("C", "block_m", "block_p", "single_buffer_weights"))
def _mlp_call(x, w1p, b1p, w2p, b2p, *, C, block_m=None, block_p=None,
              single_buffer_weights=True):
    out_dtype = x.dtype
    B, _ = x.shape
    n_p, P_p = w1p.shape
    C_p = w2p.shape[1]

    w_dtype = w1p.dtype
    x = x.astype(w_dtype)                       # match MXU operand dtype
    w_sz = jnp.dtype(w_dtype).itemsize
    o_sz = jnp.dtype(out_dtype).itemsize
    sub = _sublane(w_dtype)
    budget = _vmem_budget_bytes()
    wbuf = 1 if single_buffer_weights else 2

    # ---- VMEM footprint models (trace-time Python; shapes are concrete) ----
    def resident_bytes(bm):
        return (wbuf * w_sz * (n_p * P_p + P_p * C_p + P_p + C_p)  # weights
                + 2 * bm * n_p * w_sz      # double-buffered X tiles
                + 2 * bm * C_p * o_sz      # double-buffered out tiles
                + 4 * bm * P_p)            # f32 intermediate h (live values)

    def streamed_bytes(bm, bp):
        return (2 * w_sz * (n_p * bp + bp * C_p + bp)  # W1/b1/W2 tiles, 2-deep
                + wbuf * w_sz * C_p                    # b2
                + 2 * bm * n_p * w_sz                  # X tiles
                + 2 * bm * C_p * o_sz                  # out tiles
                + 4 * bm * C_p                         # f32 accumulator scratch
                + 4 * bm * bp)                         # f32 intermediate h

    def pick_block_m(fits):
        if block_m is not None:
            return max(sub, _round_up(block_m, sub))
        cap = _round_up(B, sub)
        chosen = None
        for c in _BLOCK_M_CANDIDATES:          # largest tile that fits VMEM
            if c % sub or c > cap:
                continue
            if fits(c):
                chosen = c
                break
        if chosen is None:
            chosen = sub
        # Keep >=2 batch tiles when the batch allows it (v7x has 2 TCs).
        if _cdiv(B, chosen) < 2 and B > sub:
            chosen = min(chosen, _round_up(_cdiv(B, 2), sub))
        return chosen

    force_streamed = block_p is not None
    resident_fits = resident_bytes(sub) <= budget

    def _wmode():
        return dict(pipeline_mode=pl.Buffered(1)) if single_buffer_weights else {}

    if force_streamed or not resident_fits:
        # ---- streamed path: tile hidden dim P, accumulate in f32 scratch ----
        if block_p is not None:
            bp = min(P_p, max(_LANE, _round_up(block_p, _LANE)))
            while P_p % bp:
                bp -= _LANE
        else:
            bp = _LANE
            for c in _BLOCK_P_CANDIDATES:
                if c <= P_p and P_p % c == 0 and streamed_bytes(sub, c) <= budget:
                    bp = c
                    break
        # TODO(synk): if even (sub, 128) weight tiles exceed VMEM (huge n),
        # add an n-reduction grid axis so W1 is tiled in both dims.
        bm = pick_block_m(lambda m: streamed_bytes(m, bp) <= budget)
        grid = (_cdiv(B, bm), P_p // bp)
        est = streamed_bytes(bm, bp)
        kernel = _mlp_kernel_streamed
        in_specs = [
            pl.BlockSpec((bm, n_p), lambda i, k: (i, 0)),      # X (reused over k)
            pl.BlockSpec((n_p, bp), lambda i, k: (0, k)),      # W1 column tile
            pl.BlockSpec((1, bp), lambda i, k: (0, k)),        # b1 tile
            pl.BlockSpec((bp, C_p), lambda i, k: (k, 0)),      # W2 row tile
            pl.BlockSpec((1, C_p), lambda i, k: (0, 0), **_wmode()),  # b2
        ]
        out_specs = pl.BlockSpec((bm, C_p), lambda i, k: (i, 0))
        scratch = [pltpu.VMEM((bm, C_p), jnp.float32)]
        dims = ("parallel", "arbitrary")
    else:
        # ---- resident path: weights live in VMEM once, single-buffered ----
        bm = pick_block_m(lambda m: resident_bytes(m) <= budget)
        grid = (_cdiv(B, bm),)
        est = resident_bytes(bm)
        kernel = _mlp_kernel_resident
        in_specs = [
            pl.BlockSpec((bm, n_p), lambda i: (i, 0)),                    # X tile
            pl.BlockSpec((n_p, P_p), lambda i: (0, 0), **_wmode()),       # W1
            pl.BlockSpec((1, P_p), lambda i: (0, 0), **_wmode()),         # b1
            pl.BlockSpec((P_p, C_p), lambda i: (0, 0), **_wmode()),       # W2
            pl.BlockSpec((1, C_p), lambda i: (0, 0), **_wmode()),         # b2
        ]
        out_specs = pl.BlockSpec((bm, C_p), lambda i: (i, 0))
        scratch = []
        dims = ("parallel",)

    B_p = grid[0] * bm
    xp = _pad2d(x, B_p, n_p)   # only X is padded per call; weights pre-padded

    vmem_limit = int(min(budget, max(2 * est, 32 * 1024 * 1024)))
    cost = pl.CostEstimate(
        flops=2 * B_p * (n_p * P_p + P_p * C_p),
        transcendentals=0,
        bytes_accessed=(w_sz * (B_p * n_p + n_p * P_p + P_p * C_p + P_p + C_p)
                        + o_sz * B_p * C_p),
    )

    out_padded = pl.pallas_call(
        kernel,
        out_shape=jax.ShapeDtypeStruct((B_p, C_p), out_dtype),
        grid_spec=pltpu.PrefetchScalarGridSpec(
            num_scalar_prefetch=0,
            grid=grid,
            in_specs=in_specs,
            out_specs=out_specs,
            scratch_shapes=scratch,
        ),
        compiler_params=pltpu.CompilerParams(
            dimension_semantics=dims,
            vmem_limit_bytes=vmem_limit,
        ),
        cost_estimate=cost,
    )(xp, w1p, b1p, w2p, b2p)

    return out_padded[:B, :C]


def two_layer_mlp(x, params: PaddedParams, *, block_m=None, block_p=None):
    """y = relu(x @ W1 + b1) @ W2 + b2 with pre-padded params."""
    kwargs = dict(C=params.C, block_m=block_m, block_p=block_p)
    try:
        return _mlp_call(x, params.w1, params.b1, params.w2, params.b2,
                         single_buffer_weights=True, **kwargs)
    except Exception:
        # Fallback for JAX builds that reject pl.Buffered(1) on constant-index
        # BlockSpecs: use default double-buffered weights instead.
        return _mlp_call(x, params.w1, params.b1, params.w2, params.b2,
                         single_buffer_weights=False, **kwargs)


if __name__ == "__main__":
    # Module: TwolayerMLP(n, P, C) = Linear(n, P) -> ReLU -> Linear(P, C)
    B, n, P, C = 8, 32, 64, 16

    key = jax.random.PRNGKey(0)
    kx, kw1, kb1, kw2, kb2 = jax.random.split(key, 5)

    x = jax.random.normal(kx, (B, n), dtype=jnp.float32)
    # Parameters stored pre-transposed as (in, out), so y = x @ W + b.
    w1 = jax.random.normal(kw1, (n, P), dtype=jnp.float32) * 0.1
    b1 = jax.random.normal(kb1, (P,), dtype=jnp.float32) * 0.1
    w2 = jax.random.normal(kw2, (P, C), dtype=jnp.float32) * 0.1
    b2 = jax.random.normal(kb2, (C,), dtype=jnp.float32) * 0.1

    params = prepare_params(w1, b1, w2, b2)   # pad once, reuse across calls

    y = two_layer_mlp(x, params)              # resident-weight path
    jax.block_until_ready(y)
    ref = jnp.maximum(x @ w1 + b1, 0.0) @ w2 + b2
    assert y.shape == (B, C)
    assert jnp.allclose(y, ref, atol=1e-5, rtol=1e-5)

    # Also exercise the streamed (P-tiled accumulator) path at small scale.
    B2, n2, P2, C2 = 24, 96, 384, 48
    k2 = jax.random.split(jax.random.PRNGKey(0), 5)
    x2 = jax.random.normal(k2[0], (B2, n2), dtype=jnp.float32)
    w1b = jax.random.normal(k2[1], (n2, P2), dtype=jnp.float32) * 0.05
    b1b = jax.random.normal(k2[2], (P2,), dtype=jnp.float32) * 0.05
    w2b = jax.random.normal(k2[3], (P2, C2), dtype=jnp.float32) * 0.05
    b2b = jax.random.normal(k2[4], (C2,), dtype=jnp.float32) * 0.05
    params2 = prepare_params(w1b, b1b, w2b, b2b)
    y2 = two_layer_mlp(x2, params2, block_p=128)   # force the streamed path
    jax.block_until_ready(y2)
    ref2 = jnp.maximum(x2 @ w1b + b1b, 0.0) @ w2b + b2b
    assert y2.shape == (B2, C2)
    assert jnp.allclose(y2, ref2, atol=1e-4, rtol=1e-4)

    print("KERNEL_OK")
</pallas_src>

<mosaic_0001>
module attributes {stable_mosaic.version = 11 : i64} {
  func.func @_mlp_kernel_resident(%arg0: i32, %arg1: memref<8x128xf32, #tpu.memory_space<vmem>>, %arg2: memref<128x128xf32, #tpu.memory_space<vmem>>, %arg3: memref<1x128xf32, #tpu.memory_space<vmem>>, %arg4: memref<128x128xf32, #tpu.memory_space<vmem>>, %arg5: memref<1x128xf32, #tpu.memory_space<vmem>>, %arg6: memref<8x128xf32, #tpu.memory_space<vmem>>) attributes {dimension_semantics = [#tpu.dimension_semantics<parallel>], iteration_bounds = array<i64: 1>, scalar_prefetch = 0 : i64, scratch_operands = 0 : i64, tpu.core_type = #tpu.core_type<tc>, window_params = [{transform_indices = @transform_0, window_bounds = array<i64: 8, 128>}, {pipeline_mode = #tpu.pipeline_mode<synchronous>, transform_indices = @transform_1, window_bounds = array<i64: 128, 128>}, {pipeline_mode = #tpu.pipeline_mode<synchronous>, transform_indices = @transform_2, window_bounds = array<i64: 1, 128>}, {pipeline_mode = #tpu.pipeline_mode<synchronous>, transform_indices = @transform_3, window_bounds = array<i64: 128, 128>}, {pipeline_mode = #tpu.pipeline_mode<synchronous>, transform_indices = @transform_4, window_bounds = array<i64: 1, 128>}, {transform_indices = @transform_5, window_bounds = array<i64: 8, 128>}]} {
    %c0 = arith.constant 0 : index
    %c0_0 = arith.constant 0 : index
    %0 = vector.load %arg1[%c0, %c0_0] : memref<8x128xf32, #tpu.memory_space<vmem>>, vector<8x128xf32>
    %c0_1 = arith.constant 0 : index
    %c0_2 = arith.constant 0 : index
    %1 = vector.load %arg2[%c0_1, %c0_2] : memref<128x128xf32, #tpu.memory_space<vmem>>, vector<128x128xf32>
    %cst = arith.constant dense<0.000000e+00> : vector<8x128xf32>
    %2 = tpu.matmul %0, %1, %cst {dimension_numbers = #tpu.dot_dimension_numbers<[1], [0], [0], [1], [0, 0, 1, 1], [], []>} : vector<8x128xf32>, vector<128x128xf32>, vector<8x128xf32> -> vector<8x128xf32>
    %c0_3 = arith.constant 0 : index
    %c0_4 = arith.constant 0 : index
    %3 = vector.load %arg3[%c0_3, %c0_4] : memref<1x128xf32, #tpu.memory_space<vmem>>, vector<1x128xf32>
    %4 = vector.broadcast %3 : vector<1x128xf32> to vector<8x128xf32>
    %5 = arith.addf %2, %4 : vector<8x128xf32>
    %cst_5 = arith.constant 0.000000e+00 : f32
    %6 = vector.broadcast %cst_5 : f32 to vector<8x128xf32>
    %7 = arith.maximumf %5, %6 : vector<8x128xf32>
    %c0_6 = arith.constant 0 : index
    %c0_7 = arith.constant 0 : index
    %8 = vector.load %arg4[%c0_6, %c0_7] : memref<128x128xf32, #tpu.memory_space<vmem>>, vector<128x128xf32>
    %cst_8 = arith.constant dense<0.000000e+00> : vector<8x128xf32>
    %9 = tpu.matmul %7, %8, %cst_8 {dimension_numbers = #tpu.dot_dimension_numbers<[1], [0], [0], [1], [0, 0, 1, 1], [], []>} : vector<8x128xf32>, vector<128x128xf32>, vector<8x128xf32> -> vector<8x128xf32>
    %c0_9 = arith.constant 0 : index
    %c0_10 = arith.constant 0 : index
    %10 = vector.load %arg5[%c0_9, %c0_10] : memref<1x128xf32, #tpu.memory_space<vmem>>, vector<1x128xf32>
    %11 = vector.broadcast %10 : vector<1x128xf32> to vector<8x128xf32>
    %12 = arith.addf %9, %11 : vector<8x128xf32>
    %c0_11 = arith.constant 0 : index
    %c0_12 = arith.constant 0 : index
    %13 = vector.load %arg6[%c0_11, %c0_12] : memref<8x128xf32, #tpu.memory_space<vmem>>, vector<8x128xf32>
    tpu.vector_store %arg6[%c0_11, %c0_12], %12 {strides = array<i32>} : memref<8x128xf32, #tpu.memory_space<vmem>>, vector<8x128xf32>,
    return
  }
  func.func @transform_0(%arg0: i32) -> (i32, i32) {
    %c0_i32 = arith.constant 0 : i32
    %c0_i32_0 = arith.constant 0 : i32
    return %arg0, %c0_i32 : i32, i32
  }
  func.func @transform_1(%arg0: i32) -> (i32, i32) {
    %c0_i32 = arith.constant 0 : i32
    %c0_i32_0 = arith.constant 0 : i32
    %c0_i32_1 = arith.constant 0 : i32
    return %c0_i32, %c0_i32_0 : i32, i32
  }
  func.func @transform_2(%arg0: i32) -> (i32, i32) {
    %c0_i32 = arith.constant 0 : i32
    %c0_i32_0 = arith.constant 0 : i32
    %c0_i32_1 = arith.constant 0 : i32
    return %c0_i32, %c0_i32_0 : i32, i32
  }
  func.func @transform_3(%arg0: i32) -> (i32, i32) {
    %c0_i32 = arith.constant 0 : i32
    %c0_i32_0 = arith.constant 0 : i32
    %c0_i32_1 = arith.constant 0 : i32
    return %c0_i32, %c0_i32_0 : i32, i32
  }
  func.func @transform_4(%arg0: i32) -> (i32, i32) {
    %c0_i32 = arith.constant 0 : i32
    %c0_i32_0 = arith.constant 0 : i32
    %c0_i32_1 = arith.constant 0 : i32
    return %c0_i32, %c0_i32_0 : i32, i32
  }
  func.func @transform_5(%arg0: i32) -> (i32, i32) {
    %c0_i32 = arith.constant 0 : i32
    %c0_i32_0 = arith.constant 0 : i32
    return %arg0, %c0_i32 : i32, i32
  }
}

module attributes {stable_mosaic.version = 11 : i64} {
  func.func @_mlp_kernel_resident(%arg0: i32, %arg1: memref<8x128xf32, #tpu.memory_space<vmem>>, %arg2: memref<128x128xf32, #tpu.memory_space<vmem>>, %arg3: memref<1x128xf32, #tpu.memory_space<vmem>>, %arg4: memref<128x128xf32, #tpu.memory_space<vmem>>, %arg5: memref<1x128xf32, #tpu.memory_space<vmem>>, %arg6: memref<8x128xf32, #tpu.memory_space<vmem>>) attributes {dimension_semantics = [#tpu.dimension_semantics<parallel>], iteration_bounds = array<i64: 1>, scalar_prefetch = 0 : i64, scratch_operands = 0 : i64, tpu.core_type = #tpu.core_type<tc>, window_params = [{transform_indices = @transform_0, window_bounds = array<i64: 8, 128>}, {pipeline_mode = #tpu.pipeline_mode<synchronous>, transform_indices = @transform_1, window_bounds = array<i64: 128, 128>}, {pipeline_mode = #tpu.pipeline_mode<synchronous>, transform_indices = @transform_2, window_bounds = array<i64: 1, 128>}, {pipeline_mode = #tpu.pipeline_mode<synchronous>, transform_indices = @transform_3, window_bounds = array<i64: 128, 128>}, {pipeline_mode = #tpu.pipeline_mode<synchronous>, transform_indices = @transform_4, window_bounds = array<i64: 1, 128>}, {transform_indices = @transform_5, window_bounds = array<i64: 8, 128>}]} {
    %c0 = arith.constant 0 : index
    %c0_0 = arith.constant 0 : index
    %0 = vector.load %arg1[%c0, %c0_0] : memref<8x128xf32, #tpu.memory_space<vmem>>, vector<8x128xf32>
    %c0_1 = arith.constant 0 : index
    %c0_2 = arith.constant 0 : index
    %1 = vector.load %arg2[%c0_1, %c0_2] : memref<128x128xf32, #tpu.memory_space<vmem>>, vector<128x128xf32>
    %cst = arith.constant dense<0.000000e+00> : vector<8x128xf32>
    %2 = tpu.matmul %0, %1, %cst {dimension_numbers = #tpu.dot_dimension_numbers<[1], [0], [0], [1], [0, 0, 1, 1], [], []>} : vector<8x128xf32>, vector<128x128xf32>, vector<8x128xf32> -> vector<8x128xf32>
    %c0_3 = arith.constant 0 : index
    %c0_4 = arith.constant 0 : index
    %3 = vector.load %arg3[%c0_3, %c0_4] : memref<1x128xf32, #tpu.memory_space<vmem>>, vector<1x128xf32>
    %4 = vector.broadcast %3 : vector<1x128xf32> to vector<8x128xf32>
    %5 = arith.addf %2, %4 : vector<8x128xf32>
    %cst_5 = arith.constant 0.000000e+00 : f32
    %6 = vector.broadcast %cst_5 : f32 to vector<8x128xf32>
    %7 = arith.maximumf %5, %6 : vector<8x128xf32>
    %c0_6 = arith.constant 0 : index
    %c0_7 = arith.constant 0 : index
    %8 = vector.load %arg4[%c0_6, %c0_7] : memref<128x128xf32, #tpu.memory_space<vmem>>, vector<128x128xf32>
    %cst_8 = arith.constant dense<0.000000e+00> : vector<8x128xf32>
    %9 = tpu.matmul %7, %8, %cst_8 {dimension_numbers = #tpu.dot_dimension_numbers<[1], [0], [0], [1], [0, 0, 1, 1], [], []>} : vector<8x128xf32>, vector<128x128xf32>, vector<8x128xf32> -> vector<8x128xf32>
    %c0_9 = arith.constant 0 : index
    %c0_10 = arith.constant 0 : index
    %10 = vector.load %arg5[%c0_9, %c0_10] : memref<1x128xf32, #tpu.memory_space<vmem>>, vector<1x128xf32>
    %11 = vector.broadcast %10 : vector<1x128xf32> to vector<8x128xf32>
    %12 = arith.addf %9, %11 : vector<8x128xf32>
    %c0_11 = arith.constant 0 : index
    %c0_12 = arith.constant 0 : index
    %13 = vector.load %arg6[%c0_11, %c0_12] : memref<8x128xf32, #tpu.memory_space<vmem>>, vector<8x128xf32>
    tpu.vector_store %arg6[%c0_11, %c0_12], %12 {strides = array<i32>} : memref<8x128xf32, #tpu.memory_space<vmem>>, vector<8x128xf32>,
    return
  }
  func.func @transform_0(%arg0: i32) -> (i32, i32) {
    %c0_i32 = arith.constant 0 : i32
    %c0_i32_0 = arith.constant 0 : i32
    return %arg0, %c0_i32 : i32, i32
  }
  func.func @transform_1(%arg0: i32) -> (i32, i32) {
    %c0_i32 = arith.constant 0 : i32
    %c0_i32_0 = arith.constant 0 : i32
    %c0_i32_1 = arith.constant 0 : i32
    return %c0_i32, %c0_i32_0 : i32, i32
  }
  func.func @transform_2(%arg0: i32) -> (i32, i32) {
    %c0_i32 = arith.constant 0 : i32
    %c0_i32_0 = arith.constant 0 : i32
    %c0_i32_1 = arith.constant 0 : i32
    return %c0_i32, %c0_i32_0 : i32, i32
  }
  func.func @transform_3(%arg0: i32) -> (i32, i32) {
    %c0_i32 = arith.constant 0 : i32
    %c0_i32_0 = arith.constant 0 : i32
    %c0_i32_1 = arith.constant 0 : i32
    return %c0_i32, %c0_i32_0 : i32, i32
  }
  func.func @transform_4(%arg0: i32) -> (i32, i32) {
    %c0_i32 = arith.constant 0 : i32
    %c0_i32_0 = arith.constant 0 : i32
    %c0_i32_1 = arith.constant 0 : i32
    return %c0_i32, %c0_i32_0 : i32, i32
  }
  func.func @transform_5(%arg0: i32) -> (i32, i32) {
    %c0_i32 = arith.constant 0 : i32
    %c0_i32_0 = arith.constant 0 : i32
    return %arg0, %c0_i32 : i32, i32
  }
}

</mosaic_0001>

<bundles_post_ra>
// kernel: _mlp_call.1
= control target key start
LH: loop header
LB: loop body
LE: loop exit
PB: predicated region body
PF: predicated region fallthrough
CT: control target
= control target key end

     0   :  { %10 = vsyncpa [#allocation3], 0  ;;  %s522_s0 = inlined_call_operand.vmem [shape: f32[8,128], index: 0, kind: input, shape index: {}]   ;;  %s523_s1 = inlined_call_operand.hbm [shape: f32[128,128], index: 1, kind: input, shape index: {}]   ;;  %s524_s2 = inlined_call_operand.vmem [shape: f32[1,128], index: 2, kind: input, shape index: {}]   ;;  %s525_s3 = inlined_call_operand.hbm [shape: f32[128,128], index: 3, kind: input, shape index: {}]   ;;  %s526_s4 = inlined_call_operand.vmem [shape: f32[1,128], index: 4, kind: input, shape index: {}]   ;;  %s527_s5 = inlined_call_operand.hbm [shape: f32[8,128], index: 5, kind: output, shape index: {}]  }
   0x1   :  { %11 = vsyncpa [#allocation6], 0 }
   0x2   :  { %12 = vsyncpa [#allocation4], 0  ;;  %s433_s18 = smov [#allocation2]  }
   0x3   :  { %s20_s19 = sshll.u32 %s433_s18, 4  ;;  %s21_s19 = int_to_ptr.vmem [resolvable:$true] %s20_s19 }
   0x4   :  { %s375_s20 = scalar_lea.vmem %s21_s19, 2048  ;;  %p380_p1 = scmp.lt.s32.totalorder %s21_s19, %s21_s19 }
   0x5   :  { %p376_p0 = scmp.ne.s32.totalorder %s21_s19, %s375_s20  ;;  %p381_p2 = scmp.lt.s32.totalorder %s375_s20, %s375_s20 }
   0x7   :  { %p382_p3 = por %p381_p2, %p380_p1 }
   0x9   :  { %p383_p4 = pnand %p382_p3, %p376_p0 }
   0xb   :  { %386 = shalt.err (!%p383_p4)
}
   0xc   :  { %s434_s21 = smov 128   ;;  %s435_s22 = smov 8  }
   0xd   :  { %26 = dma.hbm_to_vmem [thread:$0]  %s523_s1, 2048, %s21_s19, [#allocation3], %s434_s21, %s434_s21, %s435_s22  }
   0xe   :  { %s436_s25 = smov [#allocation5]  }
   0xf   :  { %s34_s26 = sshll.u32 %s436_s25, 4  ;;  %s35_s26 = int_to_ptr.vmem [resolvable:$true] %s34_s26 }
  0x10   :  { %s395_s27 = scalar_lea.vmem %s35_s26, 2048  ;;  %p400_p6 = scmp.lt.s32.totalorder %s35_s26, %s35_s26 }
  0x11   :  { %p396_p5 = scmp.ne.s32.totalorder %s35_s26, %s395_s27  ;;  %p401_p7 = scmp.lt.s32.totalorder %s395_s27, %s395_s27 }
  0x13   :  { %p402_p8 = por %p401_p7, %p400_p6 }
  0x15   :  { %p403_p9 = pnand %p402_p8, %p396_p5 }
  0x17   :  { %406 = shalt.err (!%p403_p9)
}
  0x18   :  { %40 = dma.hbm_to_vmem [thread:$0]  %s525_s3, 2048, %s35_s26, [#allocation6], %s434_s21, %s434_s21, %s435_s22  }
  0x19   :  { %427 = dma.done.wait [#allocation3], 2048  }
  0x1a   :  { %428 = vsyncadd [#allocation3], 4294965248 }
  0x1b   :  { %429 = dma.done.wait [#allocation6], 2048  }
  0x1c   :  { %430 = vsyncadd [#allocation6], 4294965248  ;;  %v437_v0 = vmov 0.0   ;;  %vm438_vm0 = vmmov 0   ;;  %v65_v1 = vld [vmem:[#allocation2 + $0x78] sm:$0xff]  ;;  %v64_v2 = vld [vmem:[#allocation2 + $0x70] sm:$0xff] }
  0x1d   :  { %290 = vmatprep.subr.mxu0 %v437_v0  ;;  %322 = vmatprep.mubr.msk.f32.mxu0 %vm438_vm0, %v437_v0  ;;  %v63_v3 = vld [vmem:[#allocation2 + $0x68] sm:$0xff]  ;;  %v62_v4 = vld [vmem:[#allocation2 + $0x60] sm:$0xff]  ;;  %v159_v5 = vld [vmem:[#allocation5 + $0x78] sm:$0xff]  ;;  %s439_s8 = smov [#allocation7]  }
  0x1e   :  { %325 = vmatprep.subr.mxu1 %v437_v0  ;;  %357 = vmatprep.mubr.msk.f32.mxu1 %vm438_vm0, %v437_v0  ;;  %v61_v6 = vld [vmem:[#allocation2 + $0x58] sm:$0xff]  ;;  %v158_v7 = vld [vmem:[#allocation5 + $0x70] sm:$0xff]  ;;  %v157_v8 = vld [vmem:[#allocation5 + $0x68] sm:$0xff]  ;;  %s244_s9 = sshll.u32 %s439_s8, 4  ;;  %s245_s9 = int_to_ptr.vmem [resolvable:$true] %s244_s9 }
  0x1f   :  { %291 = vmatpush3.msra.mxu0 %v65_v1  ;;  %326 = vmatpush3.msra.mxu1 %v159_v5  ;;  %v60_v9 = vld [vmem:[#allocation2 + $0x50] sm:$0xff]  ;;  %v156_v10 = vld [vmem:[#allocation5 + $0x60] sm:$0xff]  ;;  %v59_v11 = vld [vmem:[#allocation2 + $0x48] sm:$0xff]  ;;  %s407_s10 = scalar_lea.vmem %s245_s9, 128  ;;  %p412_p11 = scmp.lt.s32.totalorder %s245_s9, %s245_s9 }
  0x20   :  { %292 = vmatprep.subr.mxu0 %v437_v0  ;;  %327 = vmatprep.subr.mxu1 %v437_v0  ;;  %v155_v12 = vld [vmem:[#allocation5 + $0x58] sm:$0xff]  ;;  %v58_v13 = vld [vmem:[#allocation2 + $0x40] sm:$0xff]  ;;  %v154_v14 = vld [vmem:[#allocation5 + $0x50] sm:$0xff]  ;;  %p408_p10 = scmp.ne.s32.totalorder %s245_s9, %s407_s10  ;;  %p413_p12 = scmp.lt.s32.totalorder %s407_s10, %s407_s10 }
  0x21   :  { %293 = vmatpush3.msra.mxu0 %v64_v2  ;;  %328 = vmatpush3.msra.mxu1 %v158_v7  ;;  %v57_v15 = vld [vmem:[#allocation2 + $0x38] sm:$0xff]  ;;  %v153_v16 = vld [vmem:[#allocation5 + $0x48] sm:$0xff]  ;;  %v56_v17 = vld [vmem:[#allocation2 + $0x30] sm:$0xff] }
  0x22   :  { %294 = vmatprep.subr.mxu0 %v437_v0  ;;  %329 = vmatprep.subr.mxu1 %v437_v0  ;;  %v152_v18 = vld [vmem:[#allocation5 + $0x40] sm:$0xff]  ;;  %v55_v19 = vld [vmem:[#allocation2 + $0x28] sm:$0xff]  ;;  %v151_v20 = vld [vmem:[#allocation5 + $0x38] sm:$0xff]  ;;  %p414_p13 = por %p413_p12, %p412_p11 }
  0x23   :  { %295 = vmatpush3.msra.mxu0 %v63_v3  ;;  %330 = vmatpush3.msra.mxu1 %v157_v8  ;;  %v54_v21 = vld [vmem:[#allocation2 + $0x20] sm:$0xff]  ;;  %v150_v22 = vld [vmem:[#allocation5 + $0x30] sm:$0xff]  ;;  %v53_v23 = vld [vmem:[#allocation2 + $0x18] sm:$0xff] }
  0x24   :  { %296 = vmatprep.subr.mxu0 %v437_v0  ;;  %331 = vmatprep.subr.mxu1 %v437_v0  ;;  %v149_v24 = vld [vmem:[#allocation5 + $0x28] sm:$0xff]  ;;  %v52_v25 = vld [vmem:[#allocation2 + $0x10] sm:$0xff]  ;;  %v148_v26 = vld [vmem:[#allocation5 + $0x20] sm:$0xff]  ;;  %p415_p0 = pnand %p414_p13, %p408_p10 }
  0x25   :  { %297 = vmatpush3.msra.mxu0 %v62_v4  ;;  %332 = vmatpush3.msra.mxu1 %v156_v10  ;;  %v51_v27 = vld [vmem:[#allocation2 + $0x8] sm:$0xff]  ;;  %v147_v28 = vld [vmem:[#allocation5 + $0x18] sm:$0xff]  ;;  %v50_v29 = vld [vmem:[#allocation2] sm:$0xff] }
  0x26   :  { %298 = vmatprep.subr.mxu0 %v437_v0  ;;  %333 = vmatprep.subr.mxu1 %v437_v0  ;;  %v49_v30 = vld [vmem:[%s522_s0] sm:$0xff]  ;;  %v146_v31 = vld [vmem:[#allocation5 + $0x10] sm:$0xff]  ;;  %v145_v32 = vld [vmem:[#allocation5 + $0x8] sm:$0xff] }
  0x27   :  { %299 = vmatpush3.msra.mxu0 %v61_v6  ;;  %334 = vmatpush3.msra.mxu1 %v155_v12  ;;  %v144_v33 = vld [vmem:[#allocation5] sm:$0xff] }
  0x28   :  { %300 = vmatprep.subr.mxu0 %v437_v0  ;;  %335 = vmatprep.subr.mxu1 %v437_v0  ;;  %v254_v34 = vld [vmem:[%s524_s2] ss:$0 sm:$0xff] }
  0x29   :  { %301 = vmatpush3.msra.mxu0 %v60_v9  ;;  %336 = vmatpush3.msra.mxu1 %v154_v14  ;;  %v255_v39 = vld [vmem:[%s526_s4] ss:$0 sm:$0xff] }
  0x2a   :  { %302 = vmatprep.subr.mxu0 %v437_v0  ;;  %337 = vmatprep.subr.mxu1 %v437_v0 }
  0x2b   :  { %303 = vmatpush3.msra.mxu0 %v59_v11  ;;  %338 = vmatpush3.msra.mxu1 %v153_v16 }
  0x2c   :  { %304 = vmatprep.subr.mxu0 %v437_v0  ;;  %339 = vmatprep.subr.mxu1 %v437_v0 }
  0x2d   :  { %305 = vmatpush3.msra.mxu0 %v58_v13  ;;  %340 = vmatpush3.msra.mxu1 %v152_v18 }
  0x2e   :  { %306 = vmatprep.subr.mxu0 %v437_v0  ;;  %341 = vmatprep.subr.mxu1 %v437_v0 }
  0x2f   :  { %307 = vmatpush3.msra.mxu0 %v57_v15  ;;  %342 = vmatpush3.msra.mxu1 %v151_v20 }
  0x30   :  { %308 = vmatprep.subr.mxu0 %v437_v0  ;;  %343 = vmatprep.subr.mxu1 %v437_v0 }
  0x31   :  { %309 = vmatpush3.msra.mxu0 %v56_v17  ;;  %344 = vmatpush3.msra.mxu1 %v150_v22 }
  0x32   :  { %310 = vmatprep.subr.mxu0 %v437_v0  ;;  %345 = vmatprep.subr.mxu1 %v437_v0 }
  0x33   :  { %311 = vmatpush3.msra.mxu0 %v55_v19  ;;  %346 = vmatpush3.msra.mxu1 %v149_v24 }
  0x34   :  { %312 = vmatprep.subr.mxu0 %v437_v0  ;;  %347 = vmatprep.subr.mxu1 %v437_v0 }
  0x35   :  { %313 = vmatpush3.msra.mxu0 %v54_v21  ;;  %348 = vmatpush3.msra.mxu1 %v148_v26 }
  0x36   :  { %314 = vmatprep.subr.mxu0 %v437_v0  ;;  %349 = vmatprep.subr.mxu1 %v437_v0 }
  0x37   :  { %315 = vmatpush3.msra.mxu0 %v53_v23  ;;  %350 = vmatpush3.msra.mxu1 %v147_v28 }
  0x38   :  { %316 = vmatprep.subr.mxu0 %v437_v0  ;;  %351 = vmatprep.subr.mxu1 %v437_v0 }
  0x39   :  { %317 = vmatpush3.msra.mxu0 %v52_v25  ;;  %352 = vmatpush3.msra.mxu1 %v146_v31 }
  0x3a   :  { %318 = vmatprep.subr.mxu0 %v437_v0  ;;  %353 = vmatprep.subr.mxu1 %v437_v0 }
  0x3b   :  { %319 = vmatpush3.msra.mxu0 %v51_v27  ;;  %354 = vmatpush3.msra.mxu1 %v145_v32 }
  0x3c   :  { %320 = vmatprep.subr.mxu0 %v437_v0  ;;  %355 = vmatprep.subr.mxu1 %v437_v0 }
  0x3d   :  { %321 = vmatpush3.msra.mxu0 %v50_v29  ;;  %356 = vmatpush3.msra.mxu1 %v144_v33 }
  0x3e   :  { %323 = vmatmul.mubr.f32.vlgmr.msra.gmra.mxu0 %v49_v30 }
  0xfe   :  { %v139_v35 = vpop.f32.mrf.mxu0 }
  0xff   :  { %v140_v36 = vadd.f32 %v254_v34, %v139_v35 }
 0x100   :  { %v324_v37 = vpop.f32.mrf.mxu0 }
 0x101   :  { %v143_v38 = vmax.f32 %v140_v36, 0.0 }
 0x103   :  { %358 = vmatmul.mubr.f32.vlgmr.msra.gmra.mxu1 %v143_v38 }
 0x1c3   :  { %v233_v40 = vpop.f32.mrf.mxu1 }
 0x1c4   :  { %v234_v41 = vadd.f32 %v255_v39, %v233_v40 }
 0x1c5   :  { %v359_v42 = vpop.f32.mrf.mxu1 }
 0x1c6   :  { %237 = vst [vmem:[#allocation7] sm:$0xff] %v234_v41 }
 0x1c7   :  { %418 = shalt.err (!%p415_p0)
}
 0x1c8   :  { %247 = dma.vmem_to_hbm [thread:$0]  %s245_s9, 128, %s527_s5, [#allocation4]  }
 0x1c9   :  { %431 = dma.done.wait [#allocation4], 128  }
 0x1ca   :  { %432 = vsyncadd [#allocation4], 4294967168 }
 0x1cb   :  { %251 = vsyncpa [#allocation3], 1 }
 0x1cc   :  { %252 = vsyncpa [#allocation6], 1 }
 0x1cd   :  { %253 = vsyncpa [#allocation4], 1 }

// kernel: _mlp_call.1
= control target key start
LH: loop header
LB: loop body
LE: loop exit
PB: predicated region body
PF: predicated region fallthrough
CT: control target
= control target key end

     0   :  { %10 = vsyncpa [#allocation3], 0  ;;  %s522_s0 = inlined_call_operand.vmem [shape: f32[8,128], index: 0, kind: input, shape index: {}]   ;;  %s523_s1 = inlined_call_operand.hbm [shape: f32[128,128], index: 1, kind: input, shape index: {}]   ;;  %s524_s2 = inlined_call_operand.vmem [shape: f32[1,128], index: 2, kind: input, shape index: {}]   ;;  %s525_s3 = inlined_call_operand.hbm [shape: f32[128,128], index: 3, kind: input, shape index: {}]   ;;  %s526_s4 = inlined_call_operand.vmem [shape: f32[1,128], index: 4, kind: input, shape index: {}]   ;;  %s527_s5 = inlined_call_operand.hbm [shape: f32[8,128], index: 5, kind: output, shape index: {}]  }
   0x1   :  { %11 = vsyncpa [#allocation6], 0 }
   0x2   :  { %12 = vsyncpa [#allocation4], 0  ;;  %s433_s18 = smov [#allocation2]  }
   0x3   :  { %s20_s19 = sshll.u32 %s433_s18, 4  ;;  %s21_s19 = int_to_ptr.vmem [resolvable:$true] %s20_s19 }
   0x4   :  { %s375_s20 = scalar_lea.vmem %s21_s19, 2048  ;;  %p380_p1 = scmp.lt.s32.totalorder %s21_s19, %s21_s19 }
   0x5   :  { %p376_p0 = scmp.ne.s32.totalorder %s21_s19, %s375_s20  ;;  %p381_p2 = scmp.lt.s32.totalorder %s375_s20, %s375_s20 }
   0x7   :  { %p382_p3 = por %p381_p2, %p380_p1 }
   0x9   :  { %p383_p4 = pnand %p382_p3, %p376_p0 }
   0xb   :  { %386 = shalt.err (!%p383_p4)
}
   0xc   :  { %s434_s21 = smov 128   ;;  %s435_s22 = smov 8  }
   0xd   :  { %26 = dma.hbm_to_vmem [thread:$0]  %s523_s1, 2048, %s21_s19, [#allocation3], %s434_s21, %s434_s21, %s435_s22  }
   0xe   :  { %s436_s25 = smov [#allocation5]  }
   0xf   :  { %s34_s26 = sshll.u32 %s436_s25, 4  ;;  %s35_s26 = int_to_ptr.vmem [resolvable:$true] %s34_s26 }
  0x10   :  { %s395_s27 = scalar_lea.vmem %s35_s26, 2048  ;;  %p400_p6 = scmp.lt.s32.totalorder %s35_s26, %s35_s26 }
  0x11   :  { %p396_p5 = scmp.ne.s32.totalorder %s35_s26, %s395_s27  ;;  %p401_p7 = scmp.lt.s32.totalorder %s395_s27, %s395_s27 }
  0x13   :  { %p402_p8 = por %p401_p7, %p400_p6 }
  0x15   :  { %p403_p9 = pnand %p402_p8, %p396_p5 }
  0x17   :  { %406 = shalt.err (!%p403_p9)
}
  0x18   :  { %40 = dma.hbm_to_vmem [thread:$0]  %s525_s3, 2048, %s35_s26, [#allocation6], %s434_s21, %s434_s21, %s435_s22  }
  0x19   :  { %427 = dma.done.wait [#allocation3], 2048  }
  0x1a   :  { %428 = vsyncadd [#allocation3], 4294965248 }
  0x1b   :  { %429 = dma.done.wait [#allocation6], 2048  }
  0x1c   :  { %430 = vsyncadd [#allocation6], 4294965248  ;;  %v437_v0 = vmov 0.0   ;;  %vm438_vm0 = vmmov 0   ;;  %v65_v1 = vld [vmem:[#allocation2 + $0x78] sm:$0xff]  ;;  %v64_v2 = vld [vmem:[#allocation2 + $0x70] sm:$0xff] }
  0x1d   :  { %290 = vmatprep.subr.mxu0 %v437_v0  ;;  %322 = vmatprep.mubr.msk.f32.mxu0 %vm438_vm0, %v437_v0  ;;  %v63_v3 = vld [vmem:[#allocation2 + $0x68] sm:$0xff]  ;;  %v62_v4 = vld [vmem:[#allocation2 + $0x60] sm:$0xff]  ;;  %v159_v5 = vld [vmem:[#allocation5 + $0x78] sm:$0xff]  ;;  %s439_s8 = smov [#allocation7]  }
  0x1e   :  { %325 = vmatprep.subr.mxu1 %v437_v0  ;;  %357 = vmatprep.mubr.msk.f32.mxu1 %vm438_vm0, %v437_v0  ;;  %v61_v6 = vld [vmem:[#allocation2 + $0x58] sm:$0xff]  ;;  %v158_v7 = vld [vmem:[#allocation5 + $0x70] sm:$0xff]  ;;  %v157_v8 = vld [vmem:[#allocation5 + $0x68] sm:$0xff]  ;;  %s244_s9 = sshll.u32 %s439_s8, 4  ;;  %s245_s9 = int_to_ptr.vmem [resolvable:$true] %s244_s9 }
  0x1f   :  { %291 = vmatpush3.msra.mxu0 %v65_v1  ;;  %326 = vmatpush3.msra.mxu1 %v159_v5  ;;  %v60_v9 = vld [vmem:[#allocation2 + $0x50] sm:$0xff]  ;;  %v156_v10 = vld [vmem:[#allocation5 + $0x60] sm:$0xff]  ;;  %v59_v11 = vld [vmem:[#allocation2 + $0x48] sm:$0xff]  ;;  %s407_s10 = scalar_lea.vmem %s245_s9, 128  ;;  %p412_p11 = scmp.lt.s32.totalorder %s245_s9, %s245_s9 }
  0x20   :  { %292 = vmatprep.subr.mxu0 %v437_v0  ;;  %327 = vmatprep.subr.mxu1 %v437_v0  ;;  %v155_v12 = vld [vmem:[#allocation5 + $0x58] sm:$0xff]  ;;  %v58_v13 = vld [vmem:[#allocation2 + $0x40] sm:$0xff]  ;;  %v154_v14 = vld [vmem:[#allocation5 + $0x50] sm:$0xff]  ;;  %p408_p10 = scmp.ne.s32.totalorder %s245_s9, %s407_s10  ;;  %p413_p12 = scmp.lt.s32.totalorder %s407_s10, %s407_s10 }
  0x21   :  { %293 = vmatpush3.msra.mxu0 %v64_v2  ;;  %328 = vmatpush3.msra.mxu1 %v158_v7  ;;  %v57_v15 = vld [vmem:[#allocation2 + $0x38] sm:$0xff]  ;;  %v153_v16 = vld [vmem:[#allocation5 + $0x48] sm:$0xff]  ;;  %v56_v17 = vld [vmem:[#allocation2 + $0x30] sm:$0xff] }
  0x22   :  { %294 = vmatprep.subr.mxu0 %v437_v0  ;;  %329 = vmatprep.subr.mxu1 %v437_v0  ;;  %v152_v18 = vld [vmem:[#allocation5 + $0x40] sm:$0xff]  ;;  %v55_v19 = vld [vmem:[#allocation2 + $0x28] sm:$0xff]  ;;  %v151_v20 = vld [vmem:[#allocation5 + $0x38] sm:$0xff]  ;;  %p414_p13 = por %p413_p12, %p412_p11 }
  0x23   :  { %295 = vmatpush3.msra.mxu0 %v63_v3  ;;  %330 = vmatpush3.msra.mxu1 %v157_v8  ;;  %v54_v21 = vld [vmem:[#allocation2 + $0x20] sm:$0xff]  ;;  %v150_v22 = vld [vmem:[#allocation5 + $0x30] sm:$0xff]  ;;  %v53_v23 = vld [vmem:[#allocation2 + $0x18] sm:$0xff] }
  0x24   :  { %296 = vmatprep.subr.mxu0 %v437_v0  ;;  %331 = vmatprep.subr.mxu1 %v437_v0  ;;  %v149_v24 = vld [vmem:[#allocation5 + $0x28] sm:$0xff]  ;;  %v52_v25 = vld [vmem:[#allocation2 + $0x10] sm:$0xff]  ;;  %v148_v26 = vld [vmem:[#allocation5 + $0x20] sm:$0xff]  ;;  %p415_p0 = pnand %p414_p13, %p408_p10 }
  0x25   :  { %297 = vmatpush3.msra.mxu0 %v62_v4  ;;  %332 = vmatpush3.msra.mxu1 %v156_v10  ;;  %v51_v27 = vld [vmem:[#allocation2 + $0x8] sm:$0xff]  ;;  %v147_v28 = vld [vmem:[#allocation5 + $0x18] sm:$0xff]  ;;  %v50_v29 = vld [vmem:[#allocation2] sm:$0xff] }
  0x26   :  { %298 = vmatprep.subr.mxu0 %v437_v0  ;;  %333 = vmatprep.subr.mxu1 %v437_v0  ;;  %v49_v30 = vld [vmem:[%s522_s0] sm:$0xff]  ;;  %v146_v31 = vld [vmem:[#allocation5 + $0x10] sm:$0xff]  ;;  %v145_v32 = vld [vmem:[#allocation5 + $0x8] sm:$0xff] }
  0x27   :  { %299 = vmatpush3.msra.mxu0 %v61_v6  ;;  %334 = vmatpush3.msra.mxu1 %v155_v12  ;;  %v144_v33 = vld [vmem:[#allocation5] sm:$0xff] }
  0x28   :  { %300 = vmatprep.subr.mxu0 %v437_v0  ;;  %335 = vmatprep.subr.mxu1 %v437_v0  ;;  %v254_v34 = vld [vmem:[%s524_s2] ss:$0 sm:$0xff] }
  0x29   :  { %301 = vmatpush3.msra.mxu0 %v60_v9  ;;  %336 = vmatpush3.msra.mxu1 %v154_v14  ;;  %v255_v39 = vld [vmem:[%s526_s4] ss:$0 sm:$0xff] }
  0x2a   :  { %302 = vmatprep.subr.mxu0 %v437_v0  ;;  %337 = vmatprep.subr.mxu1 %v437_v0 }
  0x2b   :  { %303 = vmatpush3.msra.mxu0 %v59_v11  ;;  %338 = vmatpush3.msra.mxu1 %v153_v16 }
  0x2c   :  { %304 = vmatprep.subr.mxu0 %v437_v0  ;;  %339 = vmatprep.subr.mxu1 %v437_v0 }
  0x2d   :  { %305 = vmatpush3.msra.mxu0 %v58_v13  ;;  %340 = vmatpush3.msra.mxu1 %v152_v18 }
  0x2e   :  { %306 = vmatprep.subr.mxu0 %v437_v0  ;;  %341 = vmatprep.subr.mxu1 %v437_v0 }
  0x2f   :  { %307 = vmatpush3.msra.mxu0 %v57_v15  ;;  %342 = vmatpush3.msra.mxu1 %v151_v20 }
  0x30   :  { %308 = vmatprep.subr.mxu0 %v437_v0  ;;  %343 = vmatprep.subr.mxu1 %v437_v0 }
  0x31   :  { %309 = vmatpush3.msra.mxu0 %v56_v17  ;;  %344 = vmatpush3.msra.mxu1 %v150_v22 }
  0x32   :  { %310 = vmatprep.subr.mxu0 %v437_v0  ;;  %345 = vmatprep.subr.mxu1 %v437_v0 }
  0x33   :  { %311 = vmatpush3.msra.mxu0 %v55_v19  ;;  %346 = vmatpush3.msra.mxu1 %v149_v24 }
  0x34   :  { %312 = vmatprep.subr.mxu0 %v437_v0  ;;  %347 = vmatprep.subr.mxu1 %v437_v0 }
  0x35   :  { %313 = vmatpush3.msra.mxu0 %v54_v21  ;;  %348 = vmatpush3.msra.mxu1 %v148_v26 }
  0x36   :  { %314 = vmatprep.subr.mxu0 %v437_v0  ;;  %349 = vmatprep.subr.mxu1 %v437_v0 }
  0x37   :  { %315 = vmatpush3.msra.mxu0 %v53_v23  ;;  %350 = vmatpush3.msra.mxu1 %v147_v28 }
  0x38   :  { %316 = vmatprep.subr.mxu0 %v437_v0  ;;  %351 = vmatprep.subr.mxu1 %v437_v0 }
  0x39   :  { %317 = vmatpush3.msra.mxu0 %v52_v25  ;;  %352 = vmatpush3.msra.mxu1 %v146_v31 }
  0x3a   :  { %318 = vmatprep.subr.mxu0 %v437_v0  ;;  %353 = vmatprep.subr.mxu1 %v437_v0 }
  0x3b   :  { %319 = vmatpush3.msra.mxu0 %v51_v27  ;;  %354 = vmatpush3.msra.mxu1 %v145_v32 }
  0x3c   :  { %320 = vmatprep.subr.mxu0 %v437_v0  ;;  %355 = vmatprep.subr.mxu1 %v437_v0 }
  0x3d   :  { %321 = vmatpush3.msra.mxu0 %v50_v29  ;;  %356 = vmatpush3.msra.mxu1 %v144_v33 }
  0x3e   :  { %323 = vmatmul.mubr.f32.vlgmr.msra.gmra.mxu0 %v49_v30 }
  0xfe   :  { %v139_v35 = vpop.f32.mrf.mxu0 }
  0xff   :  { %v140_v36 = vadd.f32 %v254_v34, %v139_v35 }
 0x100   :  { %v324_v37 = vpop.f32.mrf.mxu0 }
 0x101   :  { %v143_v38 = vmax.f32 %v140_v36, 0.0 }
 0x103   :  { %358 = vmatmul.mubr.f32.vlgmr.msra.gmra.mxu1 %v143_v38 }
 0x1c3   :  { %v233_v40 = vpop.f32.mrf.mxu1 }
 0x1c4   :  { %v234_v41 = vadd.f32 %v255_v39, %v233_v40 }
 0x1c5   :  { %v359_v42 = vpop.f32.mrf.mxu1 }
 0x1c6   :  { %237 = vst [vmem:[#allocation7] sm:$0xff] %v234_v41 }
 0x1c7   :  { %418 = shalt.err (!%p415_p0)
}
 0x1c8   :  { %247 = dma.vmem_to_hbm [thread:$0]  %s245_s9, 128, %s527_s5, [#allocation4]  }
 0x1c9   :  { %431 = dma.done.wait [#allocation4], 128  }
 0x1ca   :  { %432 = vsyncadd [#allocation4], 4294967168 }
 0x1cb   :  { %251 = vsyncpa [#allocation3], 1 }
 0x1cc   :  { %252 = vsyncpa [#allocation6], 1 }
 0x1cd   :  { %253 = vsyncpa [#allocation4], 1 }

</bundles_post_ra>
